<compile_context>
chip_gen: v7x
topology: tpu7x:2x2x1
jax: 0.10.0
libtpu: 0.0.40
codegen_flags: <defaults>
</compile_context>

<pallas_src>
import functools

import jax
import jax.numpy as jnp
from jax.experimental import pallas as pl
from jax.experimental.pallas import tpu as pltpu


def _pieces_per_group(d: int) -> int:
    """How many d-wide pieces to fuse into one lane-aligned 128-wide store."""
    if d < 128 and 128 % d == 0:
        return 128 // d
    return 1


def _pe_kernel(x_ref, o_ref, *, num_res: int, d: int, reseed_every: int = 4):
    """One (tr, d) input tile -> one (tr, d*(1+2*num_res)) output tile."""
    out_dtype = o_ref.dtype

    # Load the input tile exactly once; compute in f32 (v5e has no bf16
    # VPU/EUP path, and it keeps the double-angle recurrence accurate).
    xin = x_ref[...]
    x = xin.astype(jnp.float32)

    g = _pieces_per_group(d)

    def pieces():
        # Piece order matches torch.cat([x, sin0, cos0, sin1, cos1, ...], -1).
        yield xin.astype(out_dtype)
        if num_res == 0:
            return
        s = jnp.sin(x)
        c = jnp.cos(x)
        for r in range(num_res):
            yield s.astype(out_dtype)
            yield c.astype(out_dtype)
            if r + 1 < num_res:
                if (r + 1) % reseed_every == 0:
                    # Re-seed exact sin/cos every few levels so the recurrence
                    # error does not grow geometrically with r.
                    xr = x * float(2 ** (r + 1))
                    s, c = jnp.sin(xr), jnp.cos(xr)
                else:
                    # Angle doubling on the VPU: sin(2a) = 2sc, cos(2a) = c^2-s^2.
                    s, c = 2.0 * s * c, c * c - s * s

    # Fuse `g` consecutive pieces into one lane-aligned 128-wide store so the
    # writeback path uses full, unmasked vst's.  At most g (<=4 for d=32)
    # pieces are live at a time, so no 13-wide vreg-spill problem.
    buf = []
    offset = 0
    for p in pieces():
        buf.append(p)
        if len(buf) == g:
            val = buf[0] if g == 1 else jnp.concatenate(buf, axis=-1)
            o_ref[:, pl.ds(offset, g * d)] = val
            offset += g * d
            buf = []
    if buf:  # final (narrower, possibly masked) remainder group
        val = buf[0] if len(buf) == 1 else jnp.concatenate(buf, axis=-1)
        o_ref[:, pl.ds(offset, len(buf) * d)] = val


def _vmem_capacity_bytes() -> int:
    try:
        return int(pltpu.get_tpu_info().vmem_capacity_bytes)
    except Exception:  # pragma: no cover - conservative fallback (v7x per-TC)
        return 64 << 20


def _round_up(x: int, m: int) -> int:
    return -(-x // m) * m


def pe_forward(x: jax.Array, num_res: int = 6) -> jax.Array:
    """Pallas equivalent of PE(num_res)(x) for an arbitrary-rank input x."""
    orig_shape = x.shape
    d = int(orig_shape[-1])
    rows = 1
    for s in orig_shape[:-1]:
        rows *= int(s)
    rows = max(rows, 1)
    n_pieces = 1 + 2 * num_res
    d_out = d * n_pieces
    itemsize = jnp.dtype(x.dtype).itemsize

    x2d = x.reshape(rows, d)

    # ---- Generation-aware row-tile selection --------------------------------
    vmem_cap = _vmem_capacity_bytes()
    # Pipelined-tile budget: large on 128 MiB parts (v5e/v6e), tighter on the
    # 64 MiB v7x so double-buffered in+out tiles + f32 temps never collide.
    budget = (36 << 20) if vmem_cap >= (96 << 20) else (18 << 20)

    g = _pieces_per_group(d)
    # Per row: double-buffered in+out pipeline tiles + in-kernel f32 temps.
    per_row_bytes = 2 * (d + d_out) * itemsize + (4 + g) * d * 4

    tr_cap = max(8, min(32768, (budget // per_row_bytes) // 8 * 8))
    # Minimum rows per grid step (~2 MiB of traffic) so single-TC v5e/v6e are
    # never step-overhead dominated.
    min_tr = max(8, min(tr_cap, _round_up((2 << 20) // per_row_bytes + 1, 8)))

    rows8 = _round_up(rows, 8)
    if rows8 <= tr_cap:
        # Biggest-tile-first; split in two only if there is enough work so a
        # v7x megacore gets balanced halves and the pipeline has >= 2 steps.
        grid = 2 if rows8 >= 2 * min_tr else 1
    else:
        grid = -(-rows8 // tr_cap)
        # Prefer an even step count (v7x megacore balance) if tiles stay big.
        if grid % 2 == 1 and -(-rows8 // (grid + 1)) >= min_tr:
            grid += 1
    tr = min(tr_cap, _round_up(-(-rows8 // grid), 8))
    # Ragged tail handled by Pallas masking (no host-side pad / output slice).
    grid = pl.cdiv(rows, tr)

    kernel = functools.partial(_pe_kernel, num_res=num_res, d=d)

    cost = pl.CostEstimate(
        flops=rows * d * (6 * num_res + 2),
        transcendentals=2 * rows * d * (1 + max(0, (num_res - 1) // 4)),
        bytes_accessed=rows * (d + d_out) * itemsize,
    )

    # VMEM limit: double-buffered tiles + f32 temporaries, with ~1.5x headroom.
    needed = tr * per_row_bytes
    vmem_limit = max(int(needed * 1.5), 16 << 20)
    vmem_limit = min(vmem_limit, int(vmem_cap * 3 // 4))
    vmem_limit = max(vmem_limit, needed + (2 << 20))

    out2d = pl.pallas_call(
        kernel,
        out_shape=jax.ShapeDtypeStruct((rows, d_out), x.dtype),
        grid_spec=pltpu.PrefetchScalarGridSpec(
            num_scalar_prefetch=0,
            grid=(grid,),
            in_specs=[pl.BlockSpec((tr, d), lambda i: (i, 0))],
            out_specs=pl.BlockSpec((tr, d_out), lambda i: (i, 0)),
        ),
        compiler_params=pltpu.CompilerParams(
            dimension_semantics=("parallel",),
            vmem_limit_bytes=int(vmem_limit),
        ),
        cost_estimate=cost,
    )(x2d)

    return out2d.reshape(*orig_shape[:-1], d_out)


def _pe_reference(x: jax.Array, num_res: int = 6) -> jax.Array:
    outs = [x]
    for r in range(num_res):
        outs.append(jnp.sin(x * (2.0 ** r)))
        outs.append(jnp.cos(x * (2.0 ** r)))
    return jnp.concatenate(outs, axis=-1)


if __name__ == "__main__":
    num_res = 6

    # (batch, seq, hidden) positional-encoding style input.
    key = jax.random.PRNGKey(0)
    x = jax.random.normal(key, (2, 8, 32), dtype=jnp.float32)
    out = jax.block_until_ready(pe_forward(x, num_res=num_res))
    ref = _pe_reference(x, num_res=num_res)
    assert out.shape == (2, 8, 32 * (1 + 2 * num_res)), out.shape
    assert jnp.allclose(out, ref, atol=5e-4, rtol=5e-4), (
        float(jnp.max(jnp.abs(out - ref))))

    # Row count not divisible by 8 exercises the masked ragged-tail block.
    x2 = jax.random.normal(jax.random.PRNGKey(0), (3, 5, 32), dtype=jnp.float32)
    out2 = jax.block_until_ready(pe_forward(x2, num_res=num_res))
    ref2 = _pe_reference(x2, num_res=num_res)
    assert out2.shape == (3, 5, 32 * (1 + 2 * num_res)), out2.shape
    assert jnp.allclose(out2, ref2, atol=5e-4, rtol=5e-4)

    # Larger input exercises the multi-step grid (grid >= 2) and a tail block
    # that is not a multiple of the row tile.
    x3 = jax.random.normal(jax.random.PRNGKey(0), (10, 500, 32), dtype=jnp.float32)
    out3 = jax.block_until_ready(pe_forward(x3, num_res=num_res))
    ref3 = _pe_reference(x3, num_res=num_res)
    assert out3.shape == (10, 500, 32 * (1 + 2 * num_res)), out3.shape
    assert jnp.allclose(out3, ref3, atol=5e-4, rtol=5e-4)

    print("KERNEL_OK")
</pallas_src>

<mosaic_0001>
module attributes {stable_mosaic.version = 11 : i64} {
  func.func @_pe_kernel(%arg0: i32, %arg1: memref<16x32xf32, #tpu.memory_space<vmem>>, %arg2: memref<16x416xf32, #tpu.memory_space<vmem>>) attributes {dimension_semantics = [#tpu.dimension_semantics<parallel>], iteration_bounds = array<i64: 1>, scalar_prefetch = 0 : i64, scratch_operands = 0 : i64, tpu.core_type = #tpu.core_type<tc>, window_params = [{transform_indices = @transform_0, window_bounds = array<i64: 16, 32>}, {transform_indices = @transform_1, window_bounds = array<i64: 16, 416>}]} {
    %c0 = arith.constant 0 : index
    %c0_0 = arith.constant 0 : index
    %0 = vector.load %arg1[%c0, %c0_0] : memref<16x32xf32, #tpu.memory_space<vmem>>, vector<16x32xf32>
    %1 = math.sin %0 : vector<16x32xf32>
    %2 = math.cos %0 : vector<16x32xf32>
    %cst = arith.constant 2.000000e+00 : f32
    %3 = vector.broadcast %cst : f32 to vector<16x32xf32>
    %4 = arith.mulf %3, %1 : vector<16x32xf32>
    %5 = arith.mulf %4, %2 : vector<16x32xf32>
    %6 = arith.mulf %2, %2 : vector<16x32xf32>
    %7 = arith.mulf %1, %1 : vector<16x32xf32>
    %8 = arith.subf %6, %7 : vector<16x32xf32>
    %9 = tpu.concatenate %0, %1, %2, %5 in 1 : vector<16x32xf32>, vector<16x32xf32>, vector<16x32xf32>, vector<16x32xf32> -> vector<16x128xf32>
    %c0_1 = arith.constant 0 : index
    %c0_2 = arith.constant 0 : index
    %10 = vector.load %arg2[%c0_1, %c0_2] : memref<16x416xf32, #tpu.memory_space<vmem>>, vector<16x128xf32>
    tpu.vector_store %arg2[%c0_1, %c0_2], %9 {strides = array<i32>} : memref<16x416xf32, #tpu.memory_space<vmem>>, vector<16x128xf32>,
    %cst_3 = arith.constant 2.000000e+00 : f32
    %11 = vector.broadcast %cst_3 : f32 to vector<16x32xf32>
    %12 = arith.mulf %11, %5 : vector<16x32xf32>
    %13 = arith.mulf %12, %8 : vector<16x32xf32>
    %14 = arith.mulf %8, %8 : vector<16x32xf32>
    %15 = arith.mulf %5, %5 : vector<16x32xf32>
    %16 = arith.subf %14, %15 : vector<16x32xf32>
    %cst_4 = arith.constant 2.000000e+00 : f32
    %17 = vector.broadcast %cst_4 : f32 to vector<16x32xf32>
    %18 = arith.mulf %17, %13 : vector<16x32xf32>
    %19 = arith.mulf %18, %16 : vector<16x32xf32>
    %20 = arith.mulf %16, %16 : vector<16x32xf32>
    %21 = arith.mulf %13, %13 : vector<16x32xf32>
    %22 = arith.subf %20, %21 : vector<16x32xf32>
    %23 = tpu.concatenate %8, %13, %16, %19 in 1 : vector<16x32xf32>, vector<16x32xf32>, vector<16x32xf32>, vector<16x32xf32> -> vector<16x128xf32>
    %c0_5 = arith.constant 0 : index
    %c128 = arith.constant 128 : index
    %24 = vector.load %arg2[%c0_5, %c128] : memref<16x416xf32, #tpu.memory_space<vmem>>, vector<16x128xf32>
    tpu.vector_store %arg2[%c0_5, %c128], %23 {strides = array<i32>} : memref<16x416xf32, #tpu.memory_space<vmem>>, vector<16x128xf32>,
    %cst_6 = arith.constant 1.600000e+01 : f32
    %25 = vector.broadcast %cst_6 : f32 to vector<16x32xf32>
    %26 = arith.mulf %0, %25 : vector<16x32xf32>
    %27 = math.sin %26 : vector<16x32xf32>
    %28 = math.cos %26 : vector<16x32xf32>
    %cst_7 = arith.constant 2.000000e+00 : f32
    %29 = vector.broadcast %cst_7 : f32 to vector<16x32xf32>
    %30 = arith.mulf %29, %27 : vector<16x32xf32>
    %31 = arith.mulf %30, %28 : vector<16x32xf32>
    %32 = arith.mulf %28, %28 : vector<16x32xf32>
    %33 = arith.mulf %27, %27 : vector<16x32xf32>
    %34 = arith.subf %32, %33 : vector<16x32xf32>
    %35 = tpu.concatenate %22, %27, %28, %31 in 1 : vector<16x32xf32>, vector<16x32xf32>, vector<16x32xf32>, vector<16x32xf32> -> vector<16x128xf32>
    %c0_8 = arith.constant 0 : index
    %c256 = arith.constant 256 : index
    %36 = vector.load %arg2[%c0_8, %c256] : memref<16x416xf32, #tpu.memory_space<vmem>>, vector<16x128xf32>
    tpu.vector_store %arg2[%c0_8, %c256], %35 {strides = array<i32>} : memref<16x416xf32, #tpu.memory_space<vmem>>, vector<16x128xf32>,
    %c0_9 = arith.constant 0 : index
    %c384 = arith.constant 384 : index
    %37 = vector.load %arg2[%c0_9, %c384] : memref<16x416xf32, #tpu.memory_space<vmem>>, vector<16x32xf32>
    tpu.vector_store %arg2[%c0_9, %c384], %34 {strides = array<i32>} : memref<16x416xf32, #tpu.memory_space<vmem>>, vector<16x32xf32>,
    return
  }
  func.func @transform_0(%arg0: i32) -> (i32, i32) {
    %c0_i32 = arith.constant 0 : i32
    %c0_i32_0 = arith.constant 0 : i32
    return %arg0, %c0_i32 : i32, i32
  }
  func.func @transform_1(%arg0: i32) -> (i32, i32) {
    %c0_i32 = arith.constant 0 : i32
    %c0_i32_0 = arith.constant 0 : i32
    return %arg0, %c0_i32 : i32, i32
  }
}

</mosaic_0001>

<bundles_post_ra>
// kernel: tpu_custom_call.1
= control target key start
LH: loop header
LB: loop body
LE: loop exit
PB: predicated region body
PF: predicated region fallthrough
CT: control target
= control target key end

     0   :  { %6 = vsyncpa [#allocation3], 0  ;;  %s1625_s0 = inlined_call_operand.hbm [shape: f32[16,32], index: 0, kind: input, shape index: {}]   ;;  %s1626_s1 = inlined_call_operand.hbm [shape: f32[16,416], index: 1, kind: output, shape index: {}]  }
   0x1   :  { %7 = vsyncpa [#allocation4], 0  ;;  %s1140_s6 = smov [#allocation2]   ;;  %s1092_s10 = scalar_lea.hbm %s1625_s0, 256 }
   0x2   :  { %s13_s7 = sshll.u32 %s1140_s6, 4  ;;  %p1093_p0 = scmp.ne.s32.totalorder %s1625_s0, %s1092_s10  ;;  %s14_s7 = int_to_ptr.vmem [resolvable:$true] %s13_s7 }
   0x3   :  { %p1096_p1 = scmp.lt.u32.totalorder %s1092_s10, %s1625_s0 }
   0x5   :  { %p1098_p2 = pnand %p1096_p1, %p1093_p0 }
   0x7   :  { %1101 = shalt.err (!%p1098_p2)
}
   0x8   :  { %s1102_s15 = scalar_lea.vmem %s14_s7, 256  ;;  %p1107_p4 = scmp.lt.s32.totalorder %s14_s7, %s14_s7 }
   0x9   :  { %p1103_p3 = scmp.ne.s32.totalorder %s14_s7, %s1102_s15  ;;  %p1108_p5 = scmp.lt.s32.totalorder %s1102_s15, %s1102_s15 }
   0xb   :  { %p1109_p6 = por %p1108_p5, %p1107_p4 }
   0xd   :  { %p1110_p7 = pnand %p1109_p6, %p1103_p3 }
   0xf   :  { %1113 = shalt.err (!%p1110_p7)
}
  0x10   :  { %s1141_s16 = smov 128   ;;  %s1142_s17 = smov 8  }
  0x11   :  { %19 = dma.hbm_to_vmem [thread:$0]  %s1625_s0, 256, %s14_s7, [#allocation3], %s1141_s16, %s1141_s16, %s1142_s17  }
  0x12   :  { %1136 = dma.done.wait [#allocation3], 256  }
  0x13   :  { %1137 = vsyncadd [#allocation3], 4294967040  ;;  %v1176_v0 = vld [vmem:[#allocation2 + $0x8] sm:$0xff]  ;;  %v1178_v1 = vld [vmem:[#allocation2] sm:$0xff]  ;;  %v1143_v29 = vmov 683565275  }
  0x14   :  { %v129_v2 = vand.u32 2147483647, %v1176_v0  ;;  %v132_v3 = vand.u32 2139095040, %v1176_v0  ;;  %v25_v4 = vand.u32 2147483647, %v1178_v1  ;;  %v28_v5 = vand.u32 2139095040, %v1178_v1 }
  0x15   :  { %v1185_v7 = vmul.f32 16.0, %v1176_v0  ;;  %v1144_v31 = vmov 2475754826   ;;  %v1145_v33 = vmov 2131351028   ;;  %s1149_s0 = smov 64  }
  0x16   :  { %v133_v6 = vshrl.u32 %v132_v3, 23  ;;  %v136_v8 = vand.u32 8388607, %v129_v2  ;;  %v29_v9 = vshrl.u32 %v28_v5, 23  ;;  %v32_v10 = vand.u32 8388607, %v25_v4 }
  0x17   :  { %v645_v13 = vand.u32 2139095040, %v1185_v7  ;;  %v1146_v35 = vmov 2102212464   ;;  %v1147_v37 = vmov 920167782   ;;  %s1150_s20 = smov 32  }
  0x18   :  { %v1017_v11 = vadd.s32 4294967169, %v133_v6  ;;  %v1013_v12 = vadd.s32 4294967169, %v29_v9  ;;  %v137_v15 = vor.u32 8388608, %v136_v8  ;;  %v33_v16 = vor.u32 8388608, %v32_v10  ;;  %s1151_s21 = smov 96   ;;  %s1152_s22 = smov [#allocation5]  }
  0x19   :  { %v646_v18 = vshrl.u32 %v645_v13, 23  ;;  %v1148_v45 = vmov 1326507024   ;;  %s1001_s23 = sshll.u32 %s1152_s22, 4  ;;  %s1002_s23 = int_to_ptr.vmem [resolvable:$true] %s1001_s23 }
  0x1a   :  { %v139_v14 = vadd.s32 1, %v1017_v11  ;;  %v35_v17 = vadd.s32 1, %v1013_v12  ;;  %v1192_v24 = vshll.u32 %v137_v15, 8  ;;  %v1196_v27 = vshll.u32 %v33_v16, 8  ;;  %s1114_s24 = scalar_lea.vmem %s1002_s23, 1024  ;;  %p1119_p9 = scmp.lt.s32.totalorder %s1002_s23, %s1002_s23 }
  0x1b   :  { %v1033_v20 = vadd.s32 4294967169, %v646_v18  ;;  %p1115_p8 = scmp.ne.s32.totalorder %s1002_s23, %s1114_s24  ;;  %p1120_p10 = scmp.lt.s32.totalorder %s1114_s24, %s1114_s24 }
  0x1c   :  { %vm140_vm0 = vcmp.gt.s32.totalorder %v139_v14, 0  ;;  %vm36_vm1 = vcmp.gt.s32.totalorder %v35_v17, 0 }
  0x1d   :  { %v141_v19 = vsel %vm140_vm0, %v139_v14, 0  ;;  %v37_v23 = vsel %vm36_vm1, %v35_v17, 0  ;;  %v1203_v39 = vadd.s32 1, %v1033_v20  ;;  %p1121_p11 = por %p1120_p10, %p1119_p9 }
  0x1e   :  { %v142_v21 = vshrl.u32 %v141_v19, 5  ;;  %v143_v22 = vand.u32 31, %v141_v19  ;;  %v1194_v25 = vshrl.u32 %v37_v23, 5  ;;  %v39_v26 = vand.u32 31, %v37_v23 }
  0x1f   :  { %vm653_vm11 = vcmp.gt.s32.totalorder %v1203_v39, 0  ;;  %p1122_p12 = pnand %p1121_p11, %p1115_p8 }
  0x20   :  { %v144_v28 = vsub.s32 32, %v143_v22  ;;  %v146_v30 = vshll.u32 %v1143_v29, %v143_v22  ;;  %v149_v32 = vshll.u32 %v1144_v31, %v143_v22  ;;  %v152_v34 = vshll.u32 %v1145_v33, %v143_v22 }
  0x21   :  { %v155_v36 = vshll.u32 %v1146_v35, %v143_v22  ;;  %v158_v38 = vshll.u32 %v1147_v37, %v143_v22  ;;  %vm161_vm2 = vcmp.lt.s32.totalorder %v142_v21, 1  ;;  %vm162_vm3 = vcmp.lt.s32.totalorder %v142_v21, 2 }
  0x22   :  { %v145_v40 = vshrl.u32 %v1143_v29, %v144_v28  ;;  %v147_v41 = vshrl.u32 %v1144_v31, %v144_v28  ;;  %v150_v42 = vshrl.u32 %v1145_v33, %v144_v28  ;;  %v153_v43 = vshrl.u32 %v1146_v35, %v144_v28 }
  0x23   :  { %v156_v44 = vshrl.u32 %v1147_v37, %v144_v28  ;;  %v159_v46 = vshrl.u32 %v1148_v45, %v144_v28  ;;  %vm164_vm4 = vcmp.lt.s32.totalorder %v142_v21, 4  ;;  %v40_v50 = vsub.s32 32, %v39_v26 }
  0x24   :  { %v148_v47 = vor.u32 %v147_v41, %v146_v30  ;;  %v151_v48 = vor.u32 %v150_v42, %v149_v32  ;;  %v154_v49 = vor.u32 %v153_v43, %v152_v34  ;;  %vm163_vm5 = vcmp.lt.s32.totalorder %v142_v21, 3 }
  0x25   :  { %v157_v51 = vor.u32 %v156_v44, %v155_v36  ;;  %v160_v52 = vor.u32 %v159_v46, %v158_v38  ;;  %v42_v53 = vshll.u32 %v1143_v29, %v39_v26  ;;  %v45_v61 = vshll.u32 %v1144_v31, %v39_v26 }
  0x26   :  { %v165_v54 = vsel %vm161_vm2, %v145_v40, %v148_v47  ;;  %v166_v55 = vsel %vm164_vm4, %v154_v49, 2102212464  ;;  %v169_v56 = vsel %vm161_vm2, %v148_v47, %v151_v48  ;;  %v173_v57 = vsel %vm161_vm2, %v151_v48, %v154_v49 }
  0x27   :  { %v167_v58 = vsel %vm163_vm5, %v151_v48, %v166_v55  ;;  %v170_v59 = vsel %vm164_vm4, %v157_v51, 920167782  ;;  %v174_v60 = vsel %vm164_vm4, %v160_v52, 1326507024  ;;  %v41_v3 = vshrl.u32 %v1143_v29, %v40_v50 }
  0x28   :  { %v171_v62 = vsel %vm163_vm5, %v154_v49, %v170_v59  ;;  %v175_v63 = vsel %vm163_vm5, %v157_v51, %v174_v60  ;;  %v43_v5 = vshrl.u32 %v1144_v31, %v40_v50  ;;  %v168_v6 = vsel %vm162_vm3, %v165_v54, %v167_v58 }
  0x29   :  { %v172_v8 = vsel %vm162_vm3, %v169_v56, %v171_v62  ;;  %v176_v9 = vsel %vm162_vm3, %v173_v57, %v175_v63  ;;  %v46_v10 = vshrl.u32 %v1145_v33, %v40_v50  ;;  %v48_v17 = vshll.u32 %v1145_v33, %v39_v26 }
  0x2a   :  { %v1223_v11 = vmul.u32.u64.low %v1192_v24, %v176_v9  ;;  %v1224_v12 = vmul.u32.u64.high %v1192_v24, %v176_v9, %v1223_v11  ;;  %v1227_v13 = vmul.u32.u64.low %v1192_v24, %v172_v8  ;;  %v1228_v14 = vmul.u32.u64.high %v1192_v24, %v172_v8, %v1227_v13 }
  0x2b   :  { %v44_v15 = vor.u32 %v43_v5, %v42_v53  ;;  %v47_v16 = vor.u32 %v46_v10, %v45_v61  ;;  %v49_v18 = vshrl.u32 %v1146_v35, %v40_v50  ;;  %v51_v19 = vshll.u32 %v1146_v35, %v39_v26 }
  0x2c   :  { %v52_v20 = vshrl.u32 %v1147_v37, %v40_v50  ;;  %v54_v21 = vshll.u32 %v1147_v37, %v39_v26  ;;  %v55_v22 = vshrl.u32 %v1148_v45, %v40_v50  ;;  %v184_v23 = vmul.u32 %v1192_v24, %v168_v6 }
  0x2d   :  { %v50_v28 = vor.u32 %v49_v18, %v48_v17  ;;  %vm57_vm6 = vcmp.lt.s32.totalorder %v1194_v25, 1  ;;  %vm58_vm7 = vcmp.lt.s32.totalorder %v1194_v25, 2  ;;  %vm186_vm8 = vc.u32 %v1224_v12, %v1227_v13 }
  0x2e   :  { %v187_v30 = vadd.s32 1, %v1228_v14  ;;  %v53_v32 = vor.u32 %v52_v20, %v51_v19  ;;  %vm59_vm9 = vcmp.lt.s32.totalorder %v1194_v25, 3  ;;  %v56_v34 = vor.u32 %v55_v22, %v54_v21 }
  0x2f   :  { %vm60_vm10 = vcmp.lt.s32.totalorder %v1194_v25, 4  ;;  %v61_v26 = vsel %vm57_vm6, %v41_v3, %v44_v15  ;;  %v65_v36 = vsel %vm57_vm6, %v44_v15, %v47_v16  ;;  %v69_v41 = vsel %vm57_vm6, %v47_v16, %v50_v28 }
  0x30   :  { %v188_v24 = vsel %vm186_vm8, %v187_v30, %v1228_v14  ;;  %v62_v38 = vsel %vm60_vm10, %v50_v28, 2102212464  ;;  %v66_v40 = vsel %vm60_vm10, %v53_v32, 920167782  ;;  %v70_v46 = vsel %vm60_vm10, %v56_v34, 1326507024 }
  0x31   :  { %v189_v42 = vadd.s32 %v188_v24, %v184_v23  ;;  %v63_v43 = vsel %vm59_vm9, %v47_v16, %v62_v38  ;;  %v67_v44 = vsel %vm59_vm9, %v50_v28, %v66_v40  ;;  %v71_v49 = vsel %vm59_vm9, %v53_v32, %v70_v46 }
  0x32   :  { %v64_v47 = vsel %vm58_vm7, %v61_v26, %v63_v43  ;;  %v68_v48 = vsel %vm58_vm7, %v65_v36, %v67_v44  ;;  %v72_v51 = vsel %vm58_vm7, %v69_v41, %v71_v49  ;;  %v654_v56 = vsel %vm653_vm11, %v1203_v39, 0 }
  0x33   :  { %v190_v50 = vadd.s32 536870912, %v189_v42  ;;  %v1254_v52 = vmul.u32.u64.low %v1196_v27, %v68_v48  ;;  %v1255_v53 = vmul.u32.u64.high %v1196_v27, %v68_v48, %v1254_v52  ;;  %v642_v58 = vand.u32 2147483647, %v1185_v7 }
  0x34   :  { %v1259_v54 = vmul.u32.u64.low %v1196_v27, %v72_v51  ;;  %v1260_v55 = vmul.u32.u64.high %v1196_v27, %v72_v51, %v1259_v54  ;;  %v656_v59 = vand.u32 31, %v654_v56  ;;  %v80_v60 = vmul.u32 %v1196_v27, %v64_v47 }
  0x35   :  { %v1263_v57 = vshrl.u32 %v190_v50, 30  ;;  %v83_v61 = vadd.s32 1, %v1255_v53  ;;  %v649_v39 = vand.u32 8388607, %v642_v58  ;;  %v1276_v8 = vmul.f32 16.0, %v1178_v1 }
  0x36   :  { %v657_v62 = vsub.s32 32, %v656_v59  ;;  %vm82_vm12 = vc.u32 %v1260_v55, %v1254_v52  ;;  %v659_v6 = vshll.u32 %v1143_v29, %v656_v59  ;;  %v662_v10 = vshll.u32 %v1144_v31, %v656_v59 }
  0x37   :  { %v192_v25 = vshll.u32 %v1263_v57, 30  ;;  %v84_v3 = vsel %vm82_vm12, %v83_v61, %v1255_v53  ;;  %v655_v15 = vshrl.u32 %v654_v56, 5  ;;  %v668_v16 = vshll.u32 %v1146_v35, %v656_v59 }
  0x38   :  { %v85_v5 = vadd.s32 %v84_v3, %v80_v60  ;;  %v660_v9 = vshrl.u32 %v1144_v31, %v657_v62  ;;  %v663_v11 = vshrl.u32 %v1145_v33, %v657_v62  ;;  %v650_v18 = vor.u32 8388608, %v649_v39 }
  0x39   :  { %v193_v63 = vsub.s32 %v189_v42, %v192_v25  ;;  %v665_v19 = vshll.u32 %v1145_v33, %v656_v59  ;;  %v666_v20 = vshrl.u32 %v1146_v35, %v657_v62  ;;  %v669_v22 = vshrl.u32 %v1147_v37, %v657_v62 }
  0x3a   :  { %v86_v14 = vadd.s32 536870912, %v85_v5  ;;  %v671_v23 = vshll.u32 %v1147_v37, %v656_v59  ;;  %v541_v28 = vand.u32 2139095040, %v1276_v8  ;;  %v661_v32 = vor.u32 %v660_v9, %v659_v6 }
  0x3b   :  { %v195_v27 = vsub.s32 0, %v193_v63  ;;  %v664_v34 = vor.u32 %v663_v11, %v662_v10  ;;  %v672_v26 = vshrl.u32 %v1148_v45, %v657_v62  ;;  %v185_v36 = vadd.s32 %v1227_v13, %v1224_v12 }
  0x3c   :  { %v1284_v21 = vshrl.u32 %v86_v14, 30  ;;  %v670_v38 = vor.u32 %v669_v22, %v668_v16  ;;  %vm674_vm13 = vcmp.lt.s32.totalorder %v655_v15, 1  ;;  %v658_v41 = vshrl.u32 %v1143_v29, %v657_v62 }
  0x3d   :  { %v1018_v17 = vmin.u32 %v195_v27, %v193_v63  ;;  %v667_v42 = vor.u32 %v666_v20, %v665_v19  ;;  %vm677_vm14 = vcmp.lt.s32.totalorder %v655_v15, 4  ;;  %v673_v44 = vor.u32 %v672_v26, %v671_v23 }
  0x3e   :  { %v88_v24 = vshll.u32 %v1284_v21, 30  ;;  %vm675_vm15 = vcmp.lt.s32.totalorder %v655_v15, 2  ;;  %vm676_vm0 = vcmp.lt.s32.totalorder %v655_v15, 3  ;;  %v682_v47 = vsel %vm674_vm13, %v661_v32, %v664_v34 }
  0x3f   :  { %v197_v30 = vclz %v1018_v17  ;;  %v679_v46 = vsel %vm677_vm14, %v667_v42, 2102212464  ;;  %v683_v12 = vsel %vm677_vm14, %v670_v38, 920167782  ;;  %v690_v49 = vshll.u32 %v650_v18, 8 }
  0x40   :  { %v1294_v43 = vsub.s32 %v85_v5, %v88_v24  ;;  %v542_v50 = vshrl.u32 %v541_v28, 23  ;;  %v684_v56 = vsel %vm676_vm0, %v667_v42, %v683_v12  ;;  %v678_v60 = vsel %vm674_vm13, %v658_v41, %v661_v32 }
  0x41   :  { %v1019_v40 = vadd.s32 4294967294, %v197_v30  ;;  %v680_v25 = vsel %vm676_vm0, %v664_v34, %v679_v46  ;;  %v685_v61 = vsel %vm675_vm15, %v682_v47, %v684_v56  ;;  %v686_v39 = vsel %vm674_vm13, %v664_v34, %v667_v42 }
  0x42   :  { %v91_v48 = vsub.s32 0, %v1294_v43  ;;  %v687_v5 = vsel %vm677_vm14, %v673_v44, 1326507024  ;;  %v215_v6 = vsub.s32 4, %v1263_v57  ;;  %v1029_v27 = vadd.s32 4294967169, %v542_v50 }
  0x43   :  { %vm1020_vm1 = vcmp.lt.s32.totalorder %v1019_v40, 0  ;;  %v681_v11 = vsel %vm675_vm15, %v678_v60, %v680_v25  ;;  %v688_v14 = vsel %vm676_vm0, %v670_v38, %v687_v5  ;;  %vm131_vm2 = vcmp.lt.s32.totalorder %v1176_v0, 0 }
  0x44   :  { %v200_v13 = vsel %vm1020_vm1, 0, %v1019_v40  ;;  %v1014_v59 = vmin.u32 %v91_v48, %v1294_v43  ;;  %v689_v17 = vsel %vm675_vm15, %v686_v39, %v688_v14  ;;  %v81_v30 = vadd.s32 %v1254_v52, %v1260_v55 }
  0x45   :  { %v201_v51 = vsub.s32 32, %v200_v13  ;;  %v202_v53 = vshll.u32 %v193_v63, %v200_v13  ;;  %v205_v54 = vsub.s32 4294967266, %v200_v13  ;;  %v111_v32 = vsub.s32 4, %v1284_v21 }
  0x46   :  { %v93_v63 = vclz %v1014_v59  ;;  %v1311_v18 = vmul.u32.u64.low %v690_v49, %v685_v61  ;;  %v1312_v19 = vmul.u32.u64.high %v690_v49, %v685_v61, %v1311_v18  ;;  %vm27_vm4 = vcmp.lt.s32.totalorder %v1178_v1, 0 }
  0x47   :  { %v203_v62 = vshrl.u32 %v185_v36, %v201_v51  ;;  %v206_v3 = vadd.s32 127, %v205_v54  ;;  %v1315_v23 = vmul.u32.u64.low %v690_v49, %v689_v17  ;;  %v1316_v28 = vmul.u32.u64.high %v690_v49, %v689_v17, %v1315_v23 }
  0x48   :  { %v1015_v16 = vadd.s32 4294967294, %v93_v63  ;;  %v697_v26 = vmul.u32 %v690_v49, %v681_v11  ;;  %v700_v40 = vadd.s32 1, %v1312_v19  ;;  %v216_v42 = vsel %vm131_vm2, %v215_v6, %v1263_v57 }
  0x49   :  { %v204_v9 = vor.u32 %v203_v62, %v202_v53  ;;  %v207_v10 = vshll.u32 %v206_v3, 23  ;;  %vm699_vm5 = vc.u32 %v1316_v28, %v1311_v18  ;;  %v548_v52 = vadd.s32 1, %v1029_v27 }
  0x4a   :  { %vm1016_vm3 = vcmp.lt.s32.totalorder %v1015_v16, 0  ;;  %v112_v46 = vsel %vm27_vm4, %v111_v32, %v1284_v21  ;;  %vm130_vm6 = vcmp.le.f32.partialorder %v129_v2, 0.7853982  ;;  %vm1338_vm7 = vcmp.le.f32.partialorder %v25_v4, 0.7853982 }
  0x4b   :  { %v208_v20 = vor.u32 4788187, %v207_v10  ;;  %v211_v22 = vcvt.s32.f32 %v204_v9  ;;  %v96_v15 = vsel %vm1016_vm3, 0, %v1015_v16  ;;  %v218_v13 = vsel %vm130_vm6, 0, %v216_v42 }
  0x4c   :  { %v97_v36 = vsub.s32 32, %v96_v15  ;;  %v98_v24 = vshll.u32 %v1294_v43, %v96_v15  ;;  %v101_v38 = vsub.s32 4294967266, %v96_v15  ;;  %v701_v43 = vsel %vm699_vm5, %v700_v40, %v1312_v19 }
  0x4d   :  { %v209_v34 = vand.u32 2147483647, %v208_v20  ;;  %v702_v12 = vadd.s32 %v701_v43, %v697_v26  ;;  %v538_v50 = vand.u32 2147483647, %v1276_v8  ;;  %v114_v51 = vsel %vm1338_vm7, 0, %v112_v46 }
  0x4e   :  { %v99_v55 = vshrl.u32 %v81_v30, %v97_v36  ;;  %v102_v44 = vadd.s32 127, %v101_v38  ;;  %vm549_vm8 = vcmp.gt.s32.totalorder %v548_v52, 0  ;;  %v1348_v59 = vand.u32 3, %v218_v13 }
  0x4f   :  { %v212_v41 = vmul.f32 %v211_v22, %v209_v34  ;;  %v703_v2 = vadd.s32 536870912, %v702_v12  ;;  %v550_v56 = vsel %vm549_vm8, %v548_v52, 0  ;;  %v118_v62 = vadd.s32 3, %v114_v51 }
  0x50   :  { %v100_v48 = vor.u32 %v99_v55, %v98_v24  ;;  %v103_v49 = vshll.u32 %v102_v44, 23  ;;  %v552_v25 = vand.u32 31, %v550_v56  ;;  %v222_v39 = vadd.s32 3, %v218_v13 }
  0x51   :  { %v213_v47 = vxor.u32 2147483648, %v212_v41  ;;  %v1350_v60 = vshrl.u32 %v703_v2, 30  ;;  %v545_v27 = vand.u32 8388607, %v538_v50  ;;  %vm430_vm9 = vcmp.lt.s32.totalorder %v1348_v59, 2 }
  0x52   :  { %v104_v4 = vor.u32 4788187, %v103_v49  ;;  %v107_v54 = vcvt.s32.f32 %v100_v48  ;;  %v553_v5 = vsub.s32 32, %v552_v25  ;;  %v555_v6 = vshll.u32 %v1143_v29, %v552_v25 }
  0x53   :  { %v214_v21 = vsel %vm131_vm2, %v213_v47, %v212_v41  ;;  %v705_v3 = vshll.u32 %v1350_v60, 30  ;;  %v558_v9 = vshll.u32 %v1144_v31, %v552_v25  ;;  %v561_v10 = vshll.u32 %v1145_v33, %v552_v25 }
  0x54   :  { %v217_v53 = vsel %vm130_vm6, %v1176_v0, %v214_v21  ;;  %v105_v61 = vand.u32 2147483647, %v104_v4  ;;  %vm431_vm10 = vcmp.eq.s32.totalorder %v1348_v59, 0  ;;  %v556_v14 = vshrl.u32 %v1144_v31, %v553_v5 }
  0x55   :  { %1075 = vcosq.f32 %v217_v53  ;;  %v1360_v11 = vsub.s32 %v702_v12, %v705_v3  ;;  %vm221_vm11 = vweird.f32 %v1176_v0  ;;  %v559_v17 = vshrl.u32 %v1145_v33, %v553_v5 }
  0x56   :  { %1077 = vsinq.f32 %v217_v53  ;;  %v108_v63 = vmul.f32 %v107_v54, %v105_v61  ;;  %v562_v19 = vshrl.u32 %v1146_v35, %v553_v5  ;;  %v564_v20 = vshll.u32 %v1146_v35, %v552_v25 }
  0x57   :  { %v1367_v22 = vand.u32 3, %v118_v62  ;;  %v708_v23 = vsub.s32 0, %v1360_v11  ;;  %v223_v30 = vand.u32 3, %v222_v39  ;;  %v557_v32 = vor.u32 %v556_v14, %v555_v6 }
  0x58   :  { %v109_v16 = vxor.u32 2147483648, %v108_v63  ;;  %v1372_v15 = vor.u32 %v559_v17, %v558_v9  ;;  %v1374_v31 = vor.u32 %v562_v19, %v561_v10  ;;  %v565_v26 = vshrl.u32 %v1147_v37, %v553_v5 }
  0x59   :  { %vm434_vm12 = vcmp.eq.s32.totalorder %v1348_v59, 2  ;;  %v1034_v35 = vmin.u32 %v708_v23, %v1360_v11  ;;  %v1382_v36 = vand.u32 3, %v114_v51  ;;  %v546_v24 = vor.u32 8388608, %v545_v27 }
  0x5a   :  { %v110_v34 = vsel %vm27_vm4, %v109_v16, %v108_v63  ;;  %v1384_v38 = vshrl.u32 %v550_v56, 5  ;;  %v1386_v40 = vor.u32 %v565_v26, %v564_v20  ;;  %vm225_vm13 = vcmp.eq.s32.totalorder %v223_v30, 0 }
  0x5b   :  { %v113_v33 = vsel %vm1338_vm7, %v1178_v1, %v110_v34  ;;  %v710_v42 = vclz %v1034_v35  ;;  %vm228_vm14 = vcmp.eq.s32.totalorder %v223_v30, 2  ;;  %vm124_vm15 = vcmp.eq.s32.totalorder %v1367_v22, 2 }
  0x5c   :  { %1079 = vcosq.f32 %v113_v33  ;;  %v554_v44 = vshrl.u32 %v1143_v29, %v553_v5  ;;  %v567_v46 = vshll.u32 %v1147_v37, %v552_v25  ;;  %v568_v43 = vshrl.u32 %v1148_v45, %v553_v5 }
  0x5d   :  { %1081 = vsinq.f32 %v113_v33  ;;  %vm121_vm0 = vcmp.eq.s32.totalorder %v1367_v22, 0  ;;  %v698_v57 = vadd.s32 %v1311_v18, %v1316_v28  ;;  %v1035_v12 = vadd.s32 4294967294, %v710_v42 }
  0x5e   :  { %vm224_vm1 = vcmp.lt.s32.totalorder %v223_v30, 2  ;;  %vm120_vm2 = vcmp.lt.s32.totalorder %v1367_v22, 2  ;;  %vm331_vm3 = vcmp.eq.s32.totalorder %v1382_v36, 2  ;;  %v569_v29 = vor.u32 %v568_v43, %v567_v46 }
  0x5f   :  { %v1076_v41 = vpop.eup %1075  ;;  %vm570_vm4 = vcmp.lt.s32.totalorder %v1384_v38, 1  ;;  %v1400_v37 = vshll.u32 %v546_v24, 8  ;;  %vm117_vm5 = vweird.f32 %v1178_v1  ;;  %vm1036_vm6 = vcmp.lt.s32.totalorder %v1035_v12, 0 }
  0x60   :  { %v1078_v52 = vpop.eup %1077  ;;  %v229_v55 = vxor.u32 2147483648, %v1076_v41  ;;  %vm328_vm7 = vcmp.eq.s32.totalorder %v1382_v36, 0  ;;  %v713_v49 = vsel %vm1036_vm6, 0, %v1035_v12  ;;  %vm573_vm8 = vcmp.lt.s32.totalorder %v1384_v38, 4 }
  0x61   :  { %v226_v47 = vxor.u32 2147483648, %v1078_v52  ;;  %v574_v21 = vsel %vm570_vm4, %v554_v44, %v557_v32  ;;  %v714_v2 = vsub.s32 32, %v713_v49  ;;  %v715_v53 = vshll.u32 %v1360_v11, %v713_v49 }
  0x62   :  { %v436_v13 = vsel %vm434_vm12, %v229_v55, %v1078_v52  ;;  %v230_v28 = vsel %vm228_vm14, %v229_v55, %v1078_v52  ;;  %v718_v4 = vsub.s32 4294967266, %v713_v49  ;;  %v728_v54 = vsub.s32 4, %v1350_v60 }
  0x63   :  { %v433_v45 = vsel %vm431_vm10, %v1076_v41, %v226_v47  ;;  %v227_v18 = vsel %vm225_vm13, %v1076_v41, %v226_v47  ;;  %vm571_vm10 = vcmp.lt.s32.totalorder %v1384_v38, 2  ;;  %v575_v56 = vsel %vm573_vm8, %v1374_v31, 2102212464 }
  0x64   :  { %v437_v48 = vsel %vm430_vm9, %v433_v45, %v436_v13  ;;  %vm327_vm9 = vcmp.lt.s32.totalorder %v1382_v36, 2  ;;  %v578_v59 = vsel %vm570_vm4, %v557_v32, %v1372_v15  ;;  %v716_v25 = vshrl.u32 %v698_v57, %v714_v2 }
  0x65   :  { %v438_v51 = vsel %vm221_vm11, nan, %v437_v48  ;;  %v719_v61 = vadd.s32 127, %v718_v4  ;;  %v231_v62 = vsel %vm224_vm1, %v227_v18, %v230_v28  ;;  %vm572_vm12 = vcmp.lt.s32.totalorder %v1384_v38, 3 }
  0x66   :  { %461 = vrot.lane.b32.xlu1 %v438_v51, %s1149_s0  ;;  %v1080_v3 = vpop.eup %1079  ;;  %v444_v39 = vmul.f32 %v438_v51, %v438_v51  ;;  %v576_v5 = vsel %vm572_vm12, %v1372_v15, %v575_v56  ;;  %v579_v6 = vsel %vm573_vm8, %v1386_v40, 920167782  ;;  %v582_v63 = vsel %vm570_vm4, %v1372_v15, %v1374_v31 }
  0x67   :  { %v1082_v27 = vpop.eup %1081  ;;  %v125_v9 = vxor.u32 2147483648, %v1080_v3  ;;  %v717_v10 = vor.u32 %v716_v25, %v715_v53  ;;  %v720_v11 = vshll.u32 %v719_v61, 23  ;;  %v583_v14 = vsel %vm573_vm8, %v569_v29, 1326507024 }
  0x68   :  { %v122_v16 = vxor.u32 2147483648, %v1082_v27  ;;  %v232_v17 = vsel %vm221_vm11, nan, %v231_v62  ;;  %v577_v19 = vsel %vm571_vm10, %v574_v21, %v576_v5  ;;  %v580_v20 = vsel %vm572_vm12, %v1374_v31, %v579_v6 }
  0x69   :  { %v126_v23 = vsel %vm124_vm15, %v125_v9, %v1082_v27  ;;  %v721_v30 = vor.u32 4788187, %v720_v11  ;;  %v724_v32 = vcvt.s32.f32 %v717_v10  ;;  %v440_v34 = vmul.f32 2.0, %v232_v17 }
  0x6a   :  { %v123_v15 = vsel %vm121_vm0, %v1080_v3, %v122_v16  ;;  %v446_v26 = vmul.f32 %v232_v17, %v232_v17  ;;  %v581_v33 = vsel %vm571_vm10, %v578_v59, %v580_v20  ;;  %v584_v35 = vsel %vm572_vm12, %v1386_v40, %v583_v14 }
  0x6b   :  { %v127_v31 = vsel %vm120_vm2, %v123_v15, %v126_v23  ;;  %v722_v24 = vand.u32 2147483647, %v721_v30  ;;  %v333_v41 = vsel %vm331_vm3, %v125_v9, %v1082_v27  ;;  %v585_v42 = vsel %vm571_vm10, %v582_v63, %v584_v35 }
  0x6c   :  { %v1464_v52 = vsel %vm117_vm5, nan, %v127_v31  ;;  %v330_v55 = vsel %vm328_vm7, %v1080_v3, %v122_v16  ;;  %v1469_v44 = vmul.u32.u64.low %v1400_v37, %v585_v42  ;;  %v1470_v40 = vmul.u32.u64.high %v1400_v37, %v585_v42, %v1469_v44 }
  0x6d   :  { %451 = vrot.lane.b32.xlu0 %v1464_v52, %s1150_s20  ;;  %vm644_vm11 = vcmp.lt.s32.totalorder %v1185_v7, 0  ;;  %v725_v22 = vmul.f32 %v724_v32, %v722_v24  ;;  %v1475_v38 = vmul.f32 %v440_v34, %v438_v51  ;;  %vm1479_vm13 = vcmp.le.f32.partialorder %v642_v58, 0.7853982 }
  0x6e   :  { %v1483_v43 = vsub.f32 %v444_v39, %v446_v26  ;;  %v1486_v47 = vmul.u32.u64.low %v1400_v37, %v581_v33  ;;  %v1487_v57 = vmul.u32.u64.high %v1400_v37, %v581_v33, %v1486_v47  ;;  %v729_v13 = vsel %vm644_vm11, %v728_v54, %v1350_v60 }
  0x6f   :  { %v726_v12 = vxor.u32 2147483648, %v725_v22  ;;  %v334_v29 = vsel %vm327_vm9, %v330_v55, %v333_v41  ;;  %v485_v45 = vmul.f32 2.0, %v1475_v38  ;;  %v491_v28 = vmul.f32 %v1475_v38, %v1475_v38 }
  0x70   :  { %v1496_v58 = vadd.s32 %v1486_v47, %v1470_v40  ;;  %vm595_vm14 = vc.u32 %v1470_v40, %v1486_v47  ;;  %v489_v18 = vmul.f32 %v1483_v43, %v1483_v43  ;;  %v593_v60 = vmul.u32 %v1400_v37, %v577_v19 }
  0x71   :  { %v727_v48 = vsel %vm644_vm11, %v726_v12, %v725_v22  ;;  %453 = vrot.lane.b32.xlu0 %v232_v17, %s1150_s20  ;;  %v731_v49 = vsel %vm1479_vm13, 0, %v729_v13  ;;  %v335_v21 = vsel %vm117_vm5, nan, %v334_v29  ;;  %v596_v51 = vadd.s32 1, %v1487_v57 }
  0x72   :  { %v730_v36 = vsel %vm1479_vm13, %v1185_v7, %v727_v48  ;;  %v1517_v53 = vmul.f32 %v485_v45, %v1483_v43  ;;  %v1519_v37 = vsub.f32 %v489_v18, %v491_v28  ;;  %v735_v4 = vadd.s32 3, %v731_v49 }
  0x73   :  { %1083 = vcosq.f32 %v730_v36  ;;  %v597_v2 = vsel %vm595_vm14, %v596_v51, %v1487_v57  ;;  %v942_v62 = vand.u32 3, %v731_v49  ;;  %v439_v11 = vmul.f32 2.0, %v1464_v52 }
  0x74   :  { %1085 = vsinq.f32 %v730_v36  ;;  %v598_v54 = vadd.s32 %v597_v2, %v593_v60  ;;  %v1524_v56 = vmul.f32 %v1519_v37, %v1519_v37  ;;  %v1528_v1 = vmul.f32 %v1517_v53, %v1517_v53 }
  0x75   :  { %459 = vrot.lane.b32.xlu0 %v335_v21, %s1149_s0  ;;  %v736_v61 = vand.u32 3, %v735_v4  ;;  %vm947_vm0 = vcmp.eq.s32.totalorder %v942_v62, 2  ;;  %vm944_vm2 = vcmp.eq.s32.totalorder %v942_v62, 0  ;;  %vm943_vm4 = vcmp.lt.s32.totalorder %v942_v62, 2 }
  0x76   :  { %v599_v59 = vadd.s32 536870912, %v598_v54  ;;  %v503_v25 = vsub.f32 %v1524_v56, %v1528_v1  ;;  %vm734_vm5 = vweird.f32 %v1185_v7  ;;  %v445_v32 = vmul.f32 %v1464_v52, %v1464_v52 }
  0x77   :  { %vm741_vm15 = vcmp.eq.s32.totalorder %v736_v61, 2  ;;  %vm738_vm1 = vcmp.eq.s32.totalorder %v736_v61, 0  ;;  %vm737_vm3 = vcmp.lt.s32.totalorder %v736_v61, 2  ;;  %v443_v31 = vmul.f32 %v335_v21, %v335_v21 }
  0x78   :  { %v1532_v3 = vshrl.u32 %v599_v59, 30  ;;  %v1540_v24 = vmul.f32 %v439_v11, %v335_v21  ;;  %vm473_vm6 = vcmask 261120   ;;  %vm540_vm8 = vcmp.lt.s32.totalorder %v1276_v8, 0 }
  0x79   :  { %v1544_v42 = vsub.f32 %v443_v31, %v445_v32  ;;  %vm539_vm9 = vcmp.le.f32.partialorder %v538_v50, 0.7853982 }
  0x7a   :  { %v601_v39 = vshll.u32 %v1532_v3, 30  ;;  %v484_v55 = vmul.f32 2.0, %v1540_v24  ;;  %v624_v28 = vsub.s32 4, %v1532_v3  ;;  %v490_v60 = vmul.f32 %v1540_v24, %v1540_v24 }
  0x7c   :  { %v602_v6 = vsub.s32 %v598_v54, %v601_v39  ;;  %v486_v57 = vmul.f32 %v484_v55, %v1544_v42  ;;  %v625_v49 = vsel %vm540_vm8, %v624_v28, %v1532_v3 }
  0x7d   :  { %v1084_v5 = vpop.eup %1083  ;;  %v627_v54 = vsel %vm539_vm9, 0, %v625_v49 }
  0x7e   :  { %v1086_v63 = vpop.eup %1085  ;;  %v742_v27 = vxor.u32 2147483648, %v1084_v5  ;;  %v604_v10 = vsub.s32 0, %v602_v6  ;;  %v631_v50 = vadd.s32 3, %v627_v54 }
  0x7f   :  { %v739_v9 = vxor.u32 2147483648, %v1086_v63 }
  0x80   :  { %v743_v14 = vsel %vm741_vm15, %v742_v27, %v1086_v63  ;;  %v949_v16 = vsel %vm947_vm0, %v742_v27, %v1086_v63  ;;  %v1030_v20 = vmin.u32 %v604_v10, %v602_v6  ;;  %v632_v39 = vand.u32 3, %v631_v50 }
  0x81   :  { %v740_v17 = vsel %vm738_vm1, %v1084_v5, %v739_v9  ;;  %v946_v19 = vsel %vm944_vm2, %v1084_v5, %v739_v9  ;;  %v839_v5 = vand.u32 3, %v627_v54  ;;  %vm630_vm0 = vweird.f32 %v1276_v8 }
  0x82   :  { %v744_v23 = vsel %vm737_vm3, %v740_v17, %v743_v14  ;;  %v950_v30 = vsel %vm943_vm4, %v946_v19, %v949_v16  ;;  %v606_v26 = vclz %v1030_v20  ;;  %vm637_vm10 = vcmp.eq.s32.totalorder %v632_v39, 2 }
  0x83   :  { %v745_v34 = vsel %vm734_vm5, nan, %v744_v23  ;;  %v951_v15 = vsel %vm734_vm5, nan, %v950_v30  ;;  %vm844_vm12 = vcmp.eq.s32.totalorder %v839_v5, 2  ;;  %vm634_vm11 = vcmp.eq.s32.totalorder %v632_v39, 0 }
  0x84   :  { %v959_v33 = vmul.f32 %v745_v34, %v745_v34  ;;  %966 = vrot.lane.b32.xlu1 %v745_v34, %s1150_s20  ;;  %v957_v35 = vmul.f32 %v951_v15, %v951_v15  ;;  %v1031_v7 = vadd.s32 4294967294, %v606_v26  ;;  %v953_v2 = vmul.f32 2.0, %v745_v34 }
  0x85   :  { %vm841_vm13 = vcmp.eq.s32.totalorder %v839_v5, 0  ;;  %vm633_vm14 = vcmp.lt.s32.totalorder %v632_v39, 2  ;;  %vm840_vm15 = vcmp.lt.s32.totalorder %v839_v5, 2  ;;  %vm476_vm1 = vcmask 523264  }
  0x86   :  { %v961_v41 = vsub.f32 %v957_v35, %v959_v33  ;;  %vm1032_vm7 = vcmp.lt.s32.totalorder %v1031_v7, 0  ;;  %v955_v3 = vmul.f32 %v953_v2, %v951_v15  ;;  %vm479_vm2 = vcmask 785408  }
  0x87   :  { %v609_v52 = vsel %vm1032_vm7, 0, %v1031_v7 }
  0x88   :  { %995 = vst.msk [vmem:[#allocation5 + $0x38] sm:$0xff] %vm473_vm6, %v961_v41  ;;  %974 = vrot.lane.b32.xlu1 %v951_v15, %s1149_s0  ;;  %v610_v44 = vsub.s32 32, %v609_v52  ;;  %v611_v40 = vshll.u32 %v602_v6, %v609_v52  ;;  %v614_v22 = vsub.s32 4294967266, %v609_v52 }
  0x8a   :  { %v612_v46 = vshrl.u32 %v1496_v58, %v610_v44  ;;  %v615_v47 = vadd.s32 127, %v614_v22  ;;  %v488_v58 = vmul.f32 %v1544_v42, %v1544_v42 }
  0x8c   :  { %469 = vrot.lane.b32.xlu1 %v1475_v38, %s1151_s21  ;;  %v613_v12 = vor.u32 %v612_v46, %v611_v40  ;;  %v616_v13 = vshll.u32 %v615_v47, 23  ;;  %v495_v38 = vmul.f32 2.0, %v1517_v53  ;;  %v492_v51 = vsub.f32 %v488_v58, %v490_v60  ;;  %v1091_v58 = vld [vmem:[#allocation2] sm:$0xff] }
  0x8e   :  { %v617_v29 = vor.u32 4788187, %v616_v13  ;;  %v620_v45 = vcvt.s32.f32 %v613_v12  ;;  %v497_v59 = vmul.f32 %v495_v38, %v1519_v37  ;;  %v1568_v61 = vmul.f32 %v492_v51, %v492_v51 }
  0x90   :  { %506 = vrot.lane.b32.xlu1 %v486_v57, %s1150_s20  ;;  %v618_v18 = vand.u32 2147483647, %v617_v29 }
  0x92   :  { %v621_v48 = vmul.f32 %v620_v45, %v618_v18 }
  0x94   :  { %508 = vrot.lane.b32.xlu1 %v1517_v53, %s1150_s20  ;;  %v622_v36 = vxor.u32 2147483648, %v621_v48  ;;  %v1570_v53 = vmul.f32 %v486_v57, %v486_v57 }
  0x96   :  { %v623_v21 = vsel %vm540_vm8, %v622_v36, %v621_v48  ;;  %v502_v62 = vsub.f32 %v1568_v61, %v1570_v53 }
  0x97   :  { %v626_v4 = vsel %vm539_vm9, %v1276_v8, %v623_v21  ;;  %v494_v8 = vmul.f32 2.0, %v486_v57 }
  0x98   :  { %516 = vrot.lane.b32.xlu1 %v1519_v37, %s1149_s0  ;;  %1087 = vcosq.f32 %v626_v4 }
  0x99   :  { %1089 = vsinq.f32 %v626_v4  ;;  %v496_v26 = vmul.f32 %v494_v8, %v492_v51 }
  0x9c   :  { %524 = vrot.lane.b32.xlu1 %v497_v59, %s1151_s21 }
  0xa0   :  { %982 = vrot.lane.b32.xlu1 %v955_v3, %s1151_s21 }
  0xa2   :  { %v1088_v6 = vpop.eup %1087 }
  0xa3   :  { %v1090_v37 = vpop.eup %1089  ;;  %v638_v63 = vxor.u32 2147483648, %v1088_v6 }
  0xa4   :  { %v635_v27 = vxor.u32 2147483648, %v1090_v37 }
  0xa5   :  { %v639_v9 = vsel %vm637_vm10, %v638_v63, %v1090_v37  ;;  %v846_v10 = vsel %vm844_vm12, %v638_v63, %v1090_v37 }
  0xa6   :  { %v636_v11 = vsel %vm634_vm11, %v1088_v6, %v635_v27  ;;  %v843_v14 = vsel %vm841_vm13, %v1088_v6, %v635_v27 }
  0xa7   :  { %v640_v16 = vsel %vm633_vm14, %v636_v11, %v639_v9  ;;  %v847_v17 = vsel %vm840_vm15, %v843_v14, %v846_v10 }
  0xa8   :  { %v641_v19 = vsel %vm630_vm0, nan, %v640_v16  ;;  %v848_v20 = vsel %vm630_vm0, nan, %v847_v17 }
  0xa9   :  { %v952_v23 = vmul.f32 2.0, %v641_v19  ;;  %v958_v30 = vmul.f32 %v641_v19, %v641_v19  ;;  %964 = vrot.lane.b32.xlu0 %v641_v19, %s1150_s20  ;;  %v956_v32 = vmul.f32 %v848_v20, %v848_v20 }
  0xab   :  { %v960_v34 = vsub.f32 %v956_v32, %v958_v30  ;;  %v954_v15 = vmul.f32 %v952_v23, %v848_v20 }
  0xad   :  { %994 = vst.msk [vmem:[#allocation5 + $0x18] sm:$0xff] %vm473_vm6, %v960_v34  ;;  %972 = vrot.lane.b32.xlu0 %v848_v20, %s1149_s0 }
  0xb1   :  { %467 = vrot.lane.b32.xlu0 %v1540_v24, %s1151_s21 }
  0xb5   :  { %514 = vrot.lane.b32.xlu0 %v492_v51, %s1149_s0 }
  0xb9   :  { %522 = vrot.lane.b32.xlu0 %v496_v26, %s1151_s21 }
  0xbd   :  { %980 = vrot.lane.b32.xlu0 %v954_v15, %s1151_s21 }
  0xd8   :  { %v462_v33 = vpop.permute.xlu1 %461 }
  0xdf   :  { %v452_v35 = vpop.permute.xlu0 %451 }
  0xe0   :  { %v474_v60 = vsel %vm473_vm6, %v1091_v58, %v452_v35 }
  0xe3   :  { %v454_v7 = vpop.permute.xlu0 %453 }
  0xe4   :  { %v475_v52 = vsel %vm473_vm6, %v1176_v0, %v454_v7 }
  0xe5   :  { %v478_v24 = vsel %vm476_vm1, %v475_v52, %v462_v33 }
  0xe7   :  { %v460_v28 = vpop.permute.xlu0 %459 }
  0xe8   :  { %v477_v38 = vsel %vm476_vm1, %v474_v60, %v460_v28 }
  0xf6   :  { %v967_v31 = vpop.permute.xlu1 %966 }
  0xf7   :  { %v987_v0 = vsel %vm473_vm6, %v503_v25, %v967_v31 }
  0xfa   :  { %v975_v41 = vpop.permute.xlu1 %974 }
  0xfb   :  { %v989_v29 = vsel %vm476_vm1, %v987_v0, %v975_v41 }
  0xfe   :  { %v470_v55 = vpop.permute.xlu1 %469 }
  0xff   :  { %v481_v44 = vsel %vm479_vm2, %v478_v24, %v470_v55 }
 0x100   :  { %483 = vst [vmem:[#allocation5 + $0x20] sm:$0xff] %v481_v44 }
 0x102   :  { %v507_v40 = vpop.permute.xlu1 %506 }
 0x103   :  { %v528_v1 = vsel %vm473_vm6, %v1544_v42, %v507_v40 }
 0x106   :  { %v509_v22 = vpop.permute.xlu1 %508 }
 0x107   :  { %v529_v47 = vsel %vm473_vm6, %v1483_v43, %v509_v22 }
 0x10a   :  { %v517_v46 = vpop.permute.xlu1 %516 }
 0x10b   :  { %v531_v57 = vsel %vm476_vm1, %v529_v47, %v517_v46 }
 0x10e   :  { %v525_v12 = vpop.permute.xlu1 %524 }
 0x10f   :  { %v533_v13 = vsel %vm479_vm2, %v531_v57, %v525_v12 }
 0x110   :  { %535 = vst [vmem:[#allocation5 + $0x28] sm:$0xff] %v533_v13 }
 0x112   :  { %v983_v45 = vpop.permute.xlu1 %982 }
 0x113   :  { %v991_v18 = vsel %vm479_vm2, %v989_v29, %v983_v45 }
 0x114   :  { %993 = vst [vmem:[#allocation5 + $0x30] sm:$0xff] %v991_v18 }
 0x11b   :  { %v965_v48 = vpop.permute.xlu0 %964 }
 0x11c   :  { %v986_v2 = vsel %vm473_vm6, %v502_v62, %v965_v48 }
 0x11f   :  { %v973_v43 = vpop.permute.xlu0 %972 }
 0x120   :  { %v988_v4 = vsel %vm476_vm1, %v986_v2, %v973_v43 }
 0x123   :  { %v468_v36 = vpop.permute.xlu0 %467 }
 0x124   :  { %v480_v49 = vsel %vm479_vm2, %v477_v38, %v468_v36 }
 0x125   :  { %482 = vst [vmem:[#allocation5] sm:$0xff] %v480_v49 }
 0x127   :  { %v515_v56 = vpop.permute.xlu0 %514 }
 0x128   :  { %v530_v25 = vsel %vm476_vm1, %v528_v1, %v515_v56 }
 0x12b   :  { %v523_v21 = vpop.permute.xlu0 %522 }
 0x12c   :  { %v532_v51 = vsel %vm479_vm2, %v530_v25, %v523_v21 }
 0x12d   :  { %534 = vst [vmem:[#allocation5 + $0x8] sm:$0xff] %v532_v51 }
 0x12f   :  { %v981_v54 = vpop.permute.xlu0 %980 }
 0x130   :  { %v990_v59 = vsel %vm479_vm2, %v988_v4, %v981_v54 }
 0x131   :  { %992 = vst [vmem:[#allocation5 + $0x10] sm:$0xff] %v990_v59 }
 0x132   :  { %1125 = shalt.err (!%p1122_p12)
}
 0x133   :  { %s1126_s27 = scalar_lea.hbm %s1626_s1, 1024 }
 0x134   :  { %p1127_p13 = scmp.ne.s32.totalorder %s1626_s1, %s1126_s27  ;;  %p1130_p0 = scmp.lt.u32.totalorder %s1126_s27, %s1626_s1 }
 0x136   :  { %p1132_p1 = pnand %p1130_p0, %p1127_p13 }
 0x138   :  { %1135 = shalt.err (!%p1132_p1)
}
 0x139   :  { %s1153_s3 = smov 512  }
 0x13a   :  { %1007 = dma.vmem_to_hbm [thread:$0]  %s1002_s23, 1024, %s1626_s1, [#allocation4], %s1153_s3, %s1153_s3, %s1150_s20  }
 0x13b   :  { %1138 = dma.done.wait [#allocation4], 1024  }
 0x13c   :  { %1139 = vsyncadd [#allocation4], 4294966272 }
 0x13d   :  { %1011 = vsyncpa [#allocation3], 1 }
 0x13e   :  { %1012 = vsyncpa [#allocation4], 1 }

</bundles_post_ra>
